<compile_context>
chip_gen: v6e
topology: v6e:2x2x1
jax: 0.10.0
libtpu: 0.0.40
codegen_flags: <defaults>
</compile_context>

<pallas_src>
import functools

import jax
import jax.numpy as jnp
from jax.experimental import pallas as pl
from jax.experimental.pallas import tpu as pltpu


def _round_up(a, m):
    return (a + m - 1) // m * m


def _vmem_capacity_bytes():
    """Per-core VMEM capacity; conservative fallback if the query is unavailable."""
    try:
        cap = getattr(pltpu.get_tpu_info(), "vmem_capacity_bytes", None)
        if cap:
            return int(cap)
    except Exception:
        pass
    return 64 << 20  # v7x per-TensorCore VMEM (safe everywhere)


def _derive_tile_rows(hidden, adapter_p, x_itemsize, w_itemsize, vmem_budget):
    """Largest 8-aligned row tile that fits the VMEM budget (capped at 1024)."""
    # Resident once (single-buffered weights + small params).
    fixed = 2 * hidden * adapter_p * w_itemsize + (adapter_p + 3 * hidden) * 4
    # Per row:
    #   x tile  : 2 pipeline buffers * hidden * itemsize
    #   out tile: 2 pipeline buffers * hidden * itemsize
    #   h (f32) : adapter_p * 4
    #   y + LayerNorm temporaries (f32): ~3 * hidden * 4
    per_row = 4 * hidden * x_itemsize + adapter_p * 4 + 3 * hidden * 4
    avail = vmem_budget - fixed - (2 << 20)  # small slack for misc scratch
    if avail <= 0:
        return 8
    t = max(8, (avail // per_row) // 8 * 8)
    return int(min(t, 1024))


def adapter_kernel(x_ref, wd_ref, wu_ref, bd_ref, ph_ref, o_ref, *, eps, inv_hidden):
    # x_ref: (tile_rows, hidden), native dtype -> fed straight to the MXU.
    x = x_ref[...]

    # down_project (+bias) + ReLU, f32 accumulation on the MXU.
    h = jnp.dot(x, wd_ref[...], preferred_element_type=jnp.float32)
    h = jnp.maximum(h + bd_ref[...], 0.0)

    # up_project; cast activations to the weight dtype (no-op for f32).
    y = jnp.dot(h.astype(wu_ref.dtype), wu_ref[...],
                preferred_element_type=jnp.float32)

    # +bias, +residual, then LayerNorm over the hidden (lane) dim in f32.
    y = y + ph_ref[0:1, :] + x.astype(jnp.float32)

    # One-pass LayerNorm: both lane reductions issue together on the XLU.
    s1 = jnp.sum(y, axis=-1, keepdims=True)
    s2 = jnp.sum(y * y, axis=-1, keepdims=True)
    mean = s1 * inv_hidden
    var = s2 * inv_hidden - mean * mean
    y_hat = (y - mean) * jax.lax.rsqrt(var + eps)
    o_ref[...] = (y_hat * ph_ref[1:2, :] + ph_ref[2:3, :]).astype(o_ref.dtype)


def language_adapter(x, w_down, b_down, w_up, b_up, ln_gamma, ln_beta,
                     *, eps=1e-5, tile_rows=None):
    """x: [batch, seq, hidden]; weights stored (in, out). Returns x's shape/dtype."""
    batch, seq, hidden = x.shape
    adapter = w_down.shape[1]
    rows = batch * seq

    # ---- lane-dense adapter dim: pad bottleneck to a multiple of 128 -------
    # Zero-padded down-proj columns give ReLU(x@0 + 0) = 0 and meet zero rows
    # of the padded up-proj, so the result is identical to unpadded.
    adapter_p = _round_up(adapter, 128)
    if adapter_p != adapter:
        pad = adapter_p - adapter
        w_down = jnp.pad(w_down, ((0, 0), (0, pad)))
        b_down = jnp.pad(b_down, ((0, pad),))
        w_up = jnp.pad(w_up, ((0, pad), (0, 0)))

    x2d = x.reshape(rows, hidden)           # no row padding: ragged last block

    x_itemsize = x.dtype.itemsize
    w_itemsize = w_down.dtype.itemsize

    # ---- per-generation VMEM budget + row tile size -------------------------
    vmem_cap = _vmem_capacity_bytes()
    vmem_budget = max(32 << 20, vmem_cap - (8 << 20))

    if tile_rows is None:
        tile_rows = _derive_tile_rows(hidden, adapter_p, x_itemsize,
                                      w_itemsize, vmem_budget)
        # Aim for >= 2 grid steps so the row axis can shard across both
        # TensorCores on v7x (dimension_semantics=("parallel",)).
        half = _round_up(max(pl.cdiv(rows, 2), 8), 8)
        tile_rows = min(tile_rows, half)
    tile_rows = max(8, _round_up(tile_rows, 8))
    tile_rows = min(tile_rows, _round_up(rows, 8))

    grid = (pl.cdiv(rows, tile_rows),)

    # ---- consolidated small parameters --------------------------------------
    bd2 = b_down.reshape(1, adapter_p).astype(jnp.float32)        # (1, adapter_p)
    ph = jnp.stack([b_up.astype(jnp.float32),
                    ln_gamma.astype(jnp.float32),
                    ln_beta.astype(jnp.float32)], axis=0)         # (3, hidden)

    # ---- VMEM limit: includes f32 intermediates, clamped to capacity --------
    fixed_bytes = 2 * hidden * adapter_p * w_itemsize + (adapter_p + 3 * hidden) * 4
    per_row = 4 * hidden * x_itemsize + adapter_p * 4 + 3 * hidden * 4
    vmem_needed = fixed_bytes + tile_rows * per_row + (2 << 20)
    vmem_limit = int(min(max(vmem_needed, 32 << 20), vmem_cap - (4 << 20)))

    cost = pl.CostEstimate(
        flops=4 * rows * hidden * adapter_p + 10 * rows * hidden,
        transcendentals=rows,
        bytes_accessed=(2 * rows * hidden * x_itemsize
                        + 2 * hidden * adapter_p * w_itemsize),
    )

    const = lambda i: (0, 0)       # resident params: fetched once
    out2d = pl.pallas_call(
        functools.partial(adapter_kernel, eps=eps, inv_hidden=1.0 / hidden),
        out_shape=jax.ShapeDtypeStruct((rows, hidden), x.dtype),
        grid_spec=pltpu.PrefetchScalarGridSpec(
            num_scalar_prefetch=0,
            grid=grid,
            in_specs=[
                pl.BlockSpec((tile_rows, hidden), lambda i: (i, 0)),    # x tile
                pl.BlockSpec((hidden, adapter_p), const,
                             pipeline_mode=pl.Buffered(1)),             # W_down
                pl.BlockSpec((adapter_p, hidden), const,
                             pipeline_mode=pl.Buffered(1)),             # W_up
                pl.BlockSpec((1, adapter_p), const,
                             pipeline_mode=pl.Buffered(1)),             # b_down
                pl.BlockSpec((3, hidden), const,
                             pipeline_mode=pl.Buffered(1)),             # b_up/gamma/beta
            ],
            out_specs=pl.BlockSpec((tile_rows, hidden), lambda i: (i, 0)),
        ),
        compiler_params=pltpu.CompilerParams(
            dimension_semantics=("parallel",),
            vmem_limit_bytes=vmem_limit),
        cost_estimate=cost,
    )(x2d, w_down, w_up, bd2, ph)

    return out2d.reshape(batch, seq, hidden)


def reference(x, w_down, b_down, w_up, b_up, gamma, beta, eps=1e-5):
    h = jnp.maximum(x @ w_down + b_down, 0.0)
    y = h @ w_up + b_up + x
    mean = jnp.mean(y, axis=-1, keepdims=True)
    var = jnp.mean(jnp.square(y - mean), axis=-1, keepdims=True)
    return (y - mean) / jnp.sqrt(var + eps) * gamma + beta


if __name__ == "__main__":
    batch, seq, hidden, adapter = 2, 8, 32, 64

    key = jax.random.PRNGKey(0)
    kx, kwd, kbd, kwu, kbu = jax.random.split(key, 5)

    x = jax.random.normal(kx, (batch, seq, hidden), dtype=jnp.float32)

    # Linear weights stored as (in, out); equivalent to PyTorch's W^T.
    w_down = jax.random.normal(kwd, (hidden, adapter), jnp.float32) * 0.05
    b_down = jax.random.normal(kbd, (adapter,), jnp.float32) * 0.05
    w_up = jax.random.normal(kwu, (adapter, hidden), jnp.float32) * 0.05
    b_up = jax.random.normal(kbu, (hidden,), jnp.float32) * 0.05
    ln_gamma = jnp.ones((hidden,), jnp.float32)   # nn.LayerNorm default
    ln_beta = jnp.zeros((hidden,), jnp.float32)

    out = language_adapter(x, w_down, b_down, w_up, b_up, ln_gamma, ln_beta)
    out = jax.block_until_ready(out)

    ref = reference(x, w_down, b_down, w_up, b_up, ln_gamma, ln_beta)
    assert out.shape == x.shape
    assert jnp.allclose(out, ref, atol=1e-4, rtol=1e-4), "mismatch vs reference"

    print("KERNEL_OK")
</pallas_src>

<mosaic_0001>
module attributes {stable_mosaic.version = 11 : i64} {
  func.func @adapter_kernel(%arg0: i32, %arg1: memref<8x32xf32, #tpu.memory_space<vmem>>, %arg2: memref<32x128xf32, #tpu.memory_space<vmem>>, %arg3: memref<128x32xf32, #tpu.memory_space<vmem>>, %arg4: memref<1x128xf32, #tpu.memory_space<vmem>>, %arg5: memref<3x32xf32, #tpu.memory_space<vmem>>, %arg6: memref<8x32xf32, #tpu.memory_space<vmem>>) attributes {dimension_semantics = [#tpu.dimension_semantics<parallel>], iteration_bounds = array<i64: 2>, scalar_prefetch = 0 : i64, scratch_operands = 0 : i64, tpu.core_type = #tpu.core_type<tc>, window_params = [{transform_indices = @transform_0, window_bounds = array<i64: 8, 32>}, {pipeline_mode = #tpu.pipeline_mode<synchronous>, transform_indices = @transform_1, window_bounds = array<i64: 32, 128>}, {pipeline_mode = #tpu.pipeline_mode<synchronous>, transform_indices = @transform_2, window_bounds = array<i64: 128, 32>}, {pipeline_mode = #tpu.pipeline_mode<synchronous>, transform_indices = @transform_3, window_bounds = array<i64: 1, 128>}, {pipeline_mode = #tpu.pipeline_mode<synchronous>, transform_indices = @transform_4, window_bounds = array<i64: 3, 32>}, {transform_indices = @transform_5, window_bounds = array<i64: 8, 32>}]} {
    %c0 = arith.constant 0 : index
    %c0_0 = arith.constant 0 : index
    %0 = vector.load %arg1[%c0, %c0_0] : memref<8x32xf32, #tpu.memory_space<vmem>>, vector<8x32xf32>
    %c0_1 = arith.constant 0 : index
    %c0_2 = arith.constant 0 : index
    %1 = vector.load %arg2[%c0_1, %c0_2] : memref<32x128xf32, #tpu.memory_space<vmem>>, vector<32x128xf32>
    %cst = arith.constant dense<0.000000e+00> : vector<8x128xf32>
    %2 = tpu.matmul %0, %1, %cst {dimension_numbers = #tpu.dot_dimension_numbers<[1], [0], [0], [1], [0, 0, 1, 1], [], []>} : vector<8x32xf32>, vector<32x128xf32>, vector<8x128xf32> -> vector<8x128xf32>
    %c0_3 = arith.constant 0 : index
    %c0_4 = arith.constant 0 : index
    %3 = vector.load %arg4[%c0_3, %c0_4] : memref<1x128xf32, #tpu.memory_space<vmem>>, vector<1x128xf32>
    %4 = vector.broadcast %3 : vector<1x128xf32> to vector<8x128xf32>
    %5 = arith.addf %2, %4 : vector<8x128xf32>
    %cst_5 = arith.constant 0.000000e+00 : f32
    %6 = vector.broadcast %cst_5 : f32 to vector<8x128xf32>
    %7 = arith.maximumf %5, %6 : vector<8x128xf32>
    %c0_6 = arith.constant 0 : index
    %c0_7 = arith.constant 0 : index
    %8 = vector.load %arg3[%c0_6, %c0_7] : memref<128x32xf32, #tpu.memory_space<vmem>>, vector<128x32xf32>
    %cst_8 = arith.constant dense<0.000000e+00> : vector<8x32xf32>
    %9 = tpu.matmul %7, %8, %cst_8 {dimension_numbers = #tpu.dot_dimension_numbers<[1], [0], [0], [1], [0, 0, 1, 1], [], []>} : vector<8x128xf32>, vector<128x32xf32>, vector<8x32xf32> -> vector<8x32xf32>
    %c0_9 = arith.constant 0 : index
    %c0_10 = arith.constant 0 : index
    %10 = vector.load %arg5[%c0_9, %c0_10] : memref<3x32xf32, #tpu.memory_space<vmem>>, vector<1x32xf32>
    %11 = vector.broadcast %10 : vector<1x32xf32> to vector<8x32xf32>
    %12 = arith.addf %9, %11 : vector<8x32xf32>
    %13 = arith.addf %12, %0 : vector<8x32xf32>
    %cst_11 = arith.constant dense<0.000000e+00> : vector<8xf32>
    %14 = vector.multi_reduction <add>, %13, %cst_11 [1] : vector<8x32xf32> to vector<8xf32>
    %15 = vector.shape_cast %14 : vector<8xf32> to vector<8x1xf32>
    %16 = arith.mulf %13, %13 : vector<8x32xf32>
    %cst_12 = arith.constant dense<0.000000e+00> : vector<8xf32>
    %17 = vector.multi_reduction <add>, %16, %cst_12 [1] : vector<8x32xf32> to vector<8xf32>
    %18 = vector.shape_cast %17 : vector<8xf32> to vector<8x1xf32>
    %cst_13 = arith.constant 3.125000e-02 : f32
    %19 = vector.broadcast %cst_13 : f32 to vector<8x1xf32>
    %20 = arith.mulf %15, %19 : vector<8x1xf32>
    %cst_14 = arith.constant 3.125000e-02 : f32
    %21 = vector.broadcast %cst_14 : f32 to vector<8x1xf32>
    %22 = arith.mulf %18, %21 : vector<8x1xf32>
    %23 = arith.mulf %20, %20 : vector<8x1xf32>
    %24 = arith.subf %22, %23 : vector<8x1xf32>
    %25 = vector.broadcast %20 : vector<8x1xf32> to vector<8x32xf32>
    %26 = arith.subf %13, %25 : vector<8x32xf32>
    %cst_15 = arith.constant 9.99999974E-6 : f32
    %27 = vector.broadcast %cst_15 : f32 to vector<8x1xf32>
    %28 = arith.addf %24, %27 : vector<8x1xf32>
    %29 = math.rsqrt %28 : vector<8x1xf32>
    %30 = vector.broadcast %29 : vector<8x1xf32> to vector<8x32xf32>
    %31 = arith.mulf %26, %30 : vector<8x32xf32>
    %c1 = arith.constant 1 : index
    %c0_16 = arith.constant 0 : index
    %32 = vector.load %arg5[%c1, %c0_16] : memref<3x32xf32, #tpu.memory_space<vmem>>, vector<1x32xf32>
    %33 = vector.broadcast %32 : vector<1x32xf32> to vector<8x32xf32>
    %34 = arith.mulf %31, %33 : vector<8x32xf32>
    %c2 = arith.constant 2 : index
    %c0_17 = arith.constant 0 : index
    %35 = vector.load %arg5[%c2, %c0_17] : memref<3x32xf32, #tpu.memory_space<vmem>>, vector<1x32xf32>
    %36 = vector.broadcast %35 : vector<1x32xf32> to vector<8x32xf32>
    %37 = arith.addf %34, %36 : vector<8x32xf32>
    %c0_18 = arith.constant 0 : index
    %c0_19 = arith.constant 0 : index
    %38 = vector.load %arg6[%c0_18, %c0_19] : memref<8x32xf32, #tpu.memory_space<vmem>>, vector<8x32xf32>
    tpu.vector_store %arg6[%c0_18, %c0_19], %37 {strides = array<i32>} : memref<8x32xf32, #tpu.memory_space<vmem>>, vector<8x32xf32>,
    return
  }
  func.func @transform_0(%arg0: i32) -> (i32, i32) {
    %c0_i32 = arith.constant 0 : i32
    %c0_i32_0 = arith.constant 0 : i32
    return %arg0, %c0_i32 : i32, i32
  }
  func.func @transform_1(%arg0: i32) -> (i32, i32) {
    %c0_i32 = arith.constant 0 : i32
    %c0_i32_0 = arith.constant 0 : i32
    %c0_i32_1 = arith.constant 0 : i32
    return %c0_i32, %c0_i32_0 : i32, i32
  }
  func.func @transform_2(%arg0: i32) -> (i32, i32) {
    %c0_i32 = arith.constant 0 : i32
    %c0_i32_0 = arith.constant 0 : i32
    %c0_i32_1 = arith.constant 0 : i32
    return %c0_i32, %c0_i32_0 : i32, i32
  }
  func.func @transform_3(%arg0: i32) -> (i32, i32) {
    %c0_i32 = arith.constant 0 : i32
    %c0_i32_0 = arith.constant 0 : i32
    %c0_i32_1 = arith.constant 0 : i32
    return %c0_i32, %c0_i32_0 : i32, i32
  }
  func.func @transform_4(%arg0: i32) -> (i32, i32) {
    %c0_i32 = arith.constant 0 : i32
    %c0_i32_0 = arith.constant 0 : i32
    %c0_i32_1 = arith.constant 0 : i32
    return %c0_i32, %c0_i32_0 : i32, i32
  }
  func.func @transform_5(%arg0: i32) -> (i32, i32) {
    %c0_i32 = arith.constant 0 : i32
    %c0_i32_0 = arith.constant 0 : i32
    return %arg0, %c0_i32 : i32, i32
  }
}

</mosaic_0001>

<bundles_post_ra>
// kernel: tpu_custom_call.1
= control target key start
LH: loop header
LB: loop body
LE: loop exit
PB: predicated region body
PF: predicated region fallthrough
CT: control target
= control target key end

     0   :  { %10 = vsyncpa [#allocation3], 0  ;;  %s908_s0 = inlined_call_operand.vmem [shape: f32[16,32], index: 0, kind: input, shape index: {}]   ;;  %s909_s1 = inlined_call_operand.vmem [shape: f32[32,128], index: 1, kind: input, shape index: {}]   ;;  %s910_s2 = inlined_call_operand.vmem [shape: f32[128,32], index: 2, kind: input, shape index: {}]   ;;  %s911_s3 = inlined_call_operand.vmem [shape: f32[1,128], index: 3, kind: input, shape index: {}]   ;;  %s912_s4 = inlined_call_operand.vmem [shape: f32[3,32], index: 4, kind: input, shape index: {}]   ;;  %s913_s5 = inlined_call_operand.hbm [shape: f32[16,32], index: 5, kind: output, shape index: {}]  }
   0x1   :  { %12 = vsyncpa [#allocation3 + $0x1], 0  ;;  %s721_s18 = smov 0   ;;  %s723_s19 = smov 0  }
   0x2   :  { %s725_s20 = smov 0   ;;  %s727_s21 = smov 0  }
   0x3 LB: > { %s742_s22 = sadd.s32 4294967295, %s686_s21   ;;  %s500_s23 = sadd.s32 4294967294, %s686_s21   ;;  %s686_s21 = sphi %s727_s21, %s919_s21   ;;  %s682_s20 = sphi %s725_s20, %s918_s20   ;;  %s678_s19 = sphi %s723_s19, %s917_s19   ;;  %s674_s18 = sphi %s721_s18, %s916_s18  }
   0x4   : > { %s746_s24 = sadd.s32 1, %s686_s21   ;;  %s135_s25 = sadd.s32 1, %s682_s20 }
   0x5   : > { %s132_s26 = ssub.s32 %s686_s21, %s746_s24  ;;  %p145_p0 = scmp.ne.s32.totalorder %s682_s20, %s678_s19 }
   0x6   : > { %p133_p1 = scmp.eq.s32.totalorder %s132_s26, 0  ;;  %p146_p2 = scmp.eq.s32.totalorder %s742_s22, 1 }
   0x7   : > { %p151_p3 = scmp.ne.s32.totalorder %s678_s19, %s674_s18  ;;  %p152_p4 = scmp.eq.s32.totalorder %s500_s23, 1 }
   0x8   : > { %s757_s27 = scalar_select %p133_p1, %s682_s20, %s135_s25  }
   0x9   : > { %p759_p5 = por %p146_p2, %p145_p0  ;;  %p763_p6 = por %p152_p4, %p151_p3 }
   0xa   : > { %p503_p7 = scmp.ge.s32.totalorder %s686_s21, 1  ;;  %p189_p8 = scmp.lt.s32.totalorder %s686_s21, 3 }
   0xc   : > { %p190_p9 = pnand %p503_p7, %p189_p8 }
   0xd   : > { %p216_p10 = scmp.lt.s32.totalorder (!%p190_p9), %s742_s22, 1  ;;  %s213_s6 = sand.u32 (!%p190_p9), 1, %s678_s19  }
   0xe   : > { %193 = sbr.rel (%p190_p9) target bundleno = 604 (0x25c), region = 40  ;;  %s512_s12 = sshll.u32 (!%p190_p9), %s742_s22, 7 }
   0xf   : > { %s439_s17 = scalar_lea.hbm (!%p190_p9), %s913_s5, %s512_s12  ;;  %s428_s23 = scalar_lea.sflag (!%p190_p9), [#allocation3], %s213_s6 }
  0x10   : > { %s690_s26 = smov (!%p190_p9), [#allocation2]  }
  0x11   : > { %s630_s30 = sshll.u32 (!%p190_p9), %s690_s26, 4  ;;  %s631_s30 = int_to_ptr.vmem [resolvable:$false] %s630_s30 }
  0x13   : > { %v224_v0 = vld [vmem:[%s909_s1 + $0x18] sm:$0xff]  ;;  %v688_v1 = vmov 0.0   ;;  %v223_v2 = vld [vmem:[%s909_s1 + $0x10] sm:$0xff]  ;;  %vm689_vm0 = vmmov 0   ;;  %s217_s11 = scalar_select %p216_p10, %s742_s22, 1  ;;  %v222_v5 = vld [vmem:[%s909_s1 + $0x8] sm:$0xff] }
  0x14   : > { %537 = vmatprep.subr.mxu0 %v688_v1  ;;  %545 = vmatprep.mubr.msk.f32.mxu0 %vm689_vm0, %v688_v1  ;;  %v322_v3 = vld [vmem:[%s910_s2 + $0x78] sm:$0xff]  ;;  %v321_v4 = vld [vmem:[%s910_s2 + $0x70] sm:$0xff]  ;;  %v320_v6 = vld [vmem:[%s910_s2 + $0x68] sm:$0xff]  ;;  %vm232_vm1 = vcmask 261120   ;;  %s632_s22 = scalar_lea.vmem %s631_s30, 256 }
  0x15   : > { %538 = vmatpush3.msra.mxu0 %v224_v0  ;;  %548 = vmatprep.subr.mxu1 %v688_v1  ;;  %s505_s16 = sshll.u32 %s217_s11, 3  ;;  %v221_v7 = vld [vmem:[%s909_s1] sm:$0xff]  ;;  %v318_v10 = vld [vmem:[%s910_s2 + $0x58] sm:$0xff]  ;;  %v317_v11 = vld [vmem:[%s910_s2 + $0x50] sm:$0xff] }
  0x16   : > { %539 = vmatprep.subr.mxu0 %v688_v1  ;;  %549 = vmatpush3.msra.mxu1 %v322_v3  ;;  %s219_s7 = scalar_lea.vmem %s908_s0, %s505_s16  ;;  %v319_v9 = vld [vmem:[%s910_s2 + $0x60] sm:$0xff]  ;;  %v316_v12 = vld [vmem:[%s910_s2 + $0x48] sm:$0xff]  ;;  %v314_v14 = vld [vmem:[%s910_s2 + $0x38] sm:$0xff] }
  0x17   : > { %540 = vmatpush3.msra.mxu0 %v223_v2  ;;  %550 = vmatprep.subr.mxu1 %v688_v1  ;;  %v220_v8 = vld [vmem:[%s219_s7] sm:$0xff]  ;;  %v313_v15 = vld [vmem:[%s910_s2 + $0x30] sm:$0xff]  ;;  %v312_v16 = vld [vmem:[%s910_s2 + $0x28] sm:$0xff]  ;;  %s504_s7 = sshll.u32 %s213_s6, 3 }
  0x18   : > { %541 = vmatprep.subr.mxu0 %v688_v1  ;;  %551 = vmatpush3.msra.mxu1 %v321_v4  ;;  %v315_v13 = vld [vmem:[%s910_s2 + $0x40] sm:$0xff]  ;;  %v310_v18 = vld [vmem:[%s910_s2 + $0x18] sm:$0xff]  ;;  %v309_v19 = vld [vmem:[%s910_s2 + $0x10] sm:$0xff]  ;;  %s215_s13 = scalar_lea.vmem [#allocation2], %s504_s7 }
  0x19   : > { %542 = vmatpush3.msra.mxu0 %v222_v5  ;;  %552 = vmatprep.subr.mxu1 %v688_v1  ;;  %v311_v17 = vld [vmem:[%s910_s2 + $0x20] sm:$0xff]  ;;  %v308_v20 = vld [vmem:[%s910_s2 + $0x8] sm:$0xff]  ;;  %s441_s14 = sshll.u32 %s215_s13, 4  ;;  %s442_s14 = int_to_ptr.vmem [resolvable:$true] %s441_s14 }
  0x1a   : > { %543 = vmatprep.subr.mxu0 %v688_v1  ;;  %553 = vmatpush3.msra.mxu1 %v320_v6  ;;  %v307_v21 = vld [vmem:[%s910_s2] sm:$0xff]  ;;  %s626_s25 = scalar_lea.vmem %s442_s14, 128  ;;  %p633_p0 = scmp.lt.s32.totalorder %s442_s14, %s631_s30 }
  0x1b   : > { %544 = vmatpush3.msra.mxu0 %v221_v7  ;;  %554 = vmatprep.subr.mxu1 %v688_v1  ;;  %v506_v22 = vld [vmem:[%s911_s3] ss:$0 sm:$0xff]  ;;  %v509_v44 = vld [vmem:[%s912_s4 + $0x1] ss:$0 sm:$0xff]  ;;  %v510_v46 = vld [vmem:[%s912_s4 + $0x2] ss:$0 sm:$0xff]  ;;  %p627_p11 = scmp.ne.s32.totalorder %s442_s14, %s626_s25  ;;  %p634_p1 = scmp.lt.s32.totalorder %s632_s22, %s626_s25 }
  0x1c   : > { %546 = vmatmul.mubr.msk.f32.vlgmr.msra.gmra.mxu0 %vm232_vm1, %v220_v8  ;;  %555 = vmatpush3.msra.mxu1 %v319_v9  ;;  %v508_v27 = vld [vmem:[%s912_s4] ss:$0 sm:$0xff] }
  0x1d   : > { %556 = vmatprep.subr.mxu1 %v688_v1  ;;  %580 = vmatprep.mubr.msk.f32.mxu1 %vm689_vm0, %v688_v1  ;;  %p628_p12 = pnand %p627_p11, %p759_p5  ;;  %p635_p2 = por %p634_p1, %p633_p0 }
  0x1e   : > { %557 = vmatpush3.msra.mxu1 %v318_v10 }
  0x1f   : > { %558 = vmatprep.subr.mxu1 %v688_v1  ;;  %p629_p13 = pneg %p628_p12 }
  0x20   : > { %559 = vmatpush3.msra.mxu1 %v317_v11 }
  0x21   : > { %560 = vmatprep.subr.mxu1 %v688_v1  ;;  %p636_p3 = pnand %p635_p2, %p629_p13 }
  0x22   : > { %561 = vmatpush3.msra.mxu1 %v316_v12 }
  0x23   : > { %562 = vmatprep.subr.mxu1 %v688_v1 }
  0x24   : > { %563 = vmatpush3.msra.mxu1 %v315_v13 }
  0x25   : > { %564 = vmatprep.subr.mxu1 %v688_v1 }
  0x26   : > { %565 = vmatpush3.msra.mxu1 %v314_v14 }
  0x27   : > { %566 = vmatprep.subr.mxu1 %v688_v1 }
  0x28   : > { %567 = vmatpush3.msra.mxu1 %v313_v15 }
  0x29   : > { %568 = vmatprep.subr.mxu1 %v688_v1 }
  0x2a   : > { %569 = vmatpush3.msra.mxu1 %v312_v16 }
  0x2b   : > { %570 = vmatprep.subr.mxu1 %v688_v1 }
  0x2c   : > { %571 = vmatpush3.msra.mxu1 %v311_v17 }
  0x2d   : > { %572 = vmatprep.subr.mxu1 %v688_v1 }
  0x2e   : > { %573 = vmatpush3.msra.mxu1 %v310_v18 }
  0x2f   : > { %574 = vmatprep.subr.mxu1 %v688_v1 }
  0x30   : > { %575 = vmatpush3.msra.mxu1 %v309_v19 }
  0x31   : > { %576 = vmatprep.subr.mxu1 %v688_v1 }
  0x32   : > { %577 = vmatpush3.msra.mxu1 %v308_v20 }
  0x33   : > { %578 = vmatprep.subr.mxu1 %v688_v1 }
  0x34   : > { %579 = vmatpush3.msra.mxu1 %v307_v21 }
  0xdc   : > { %v302_v23 = vpop.f32.mrf.mxu0 }
  0xdd   : > { %v303_v24 = vadd.f32 %v506_v22, %v302_v23 }
  0xde   : > { %v547_v25 = vpop.f32.mrf.mxu0 }
  0xdf   : > { %v306_v26 = vmax.f32 %v303_v24, 0.0 }
  0xe1   : > { %581 = vmatmul.mubr.f32.vlgmr.msra.gmra.mxu1 %v306_v26 }
 0x1a1   : > { %v394_v28 = vpop.f32.mrf.mxu1 }
 0x1a2   : > { %v395_v29 = vadd.f32 %v508_v27, %v394_v28 }
 0x1a3   : > { %v582_v30 = vpop.f32.mrf.mxu1 }
 0x1a4   : > { %v398_v31 = vadd.f32 %v395_v29, %v220_v8 }
 0x1a6   : > { %v399_v32 = vsel %vm232_vm1, %v398_v31, 0.0  ;;  %v402_v33 = vmul.f32 %v398_v31, %v398_v31 }
 0x1a7   : > { %400 = vadd.xlane.f32.xlu0 %v399_v32 }
 0x1a8   : > { %v403_v34 = vsel %vm232_vm1, %v402_v33, 0.0 }
 0x1ab   : > { %404 = vadd.xlane.f32.xlu0 %v403_v34 }
 0x230   : > { %v401_v35 = vpop.xlane.xlu0 %400 }
 0x231   : > { %v406_v36 = vmul.f32 0.03125, %v401_v35 }
 0x233   : > { %v408_v38 = vmul.f32 %v406_v36, %v406_v36  ;;  %v410_v42 = vsub.f32 %v398_v31, %v406_v36 }
 0x234   : > { %v405_v37 = vpop.xlane.xlu0 %404 }
 0x235   : > { %v407_v39 = vmul.f32 0.03125, %v405_v37 }
 0x237   : > { %v409_v40 = vsub.f32 %v407_v39, %v408_v38 }
 0x239   : > { %v411_v41 = vadd.f32 1e-05, %v409_v40 }
 0x23b   : > { %624 = vrsqrt.f32 %v411_v41 }
 0x248   : > { %v625_v43 = vpop.eup %624 }
 0x249   : > { %v413_v45 = vmul.f32 %v625_v43, %v410_v42 }
 0x24b   : > { %v419_v47 = vmul.f32 %v509_v44, %v413_v45 }
 0x24d   : > { %v425_v48 = vadd.f32 %v510_v46, %v419_v47 }
 0x24f   : > { %426 = vst.msk [vmem:[%s215_s13] sm:$0xff] %vm232_vm1, %v425_v48 }
 0x250   : > { %639 = shalt.err (!%p636_p3)
}
 0x251   : > { %s640_s7 = scalar_lea.hbm %s439_s17, 128  ;;  %s644_s9 = scalar_lea.hbm %s913_s5, 256 }
 0x252   : > { %p641_p4 = scmp.ne.s32.totalorder %s439_s17, %s640_s7  ;;  %p645_p9 = scmp.lt.s32.totalorder %s439_s17, %s913_s5 }
 0x253   : > { %p646_p10 = scmp.lt.s32.totalorder %s644_s9, %s640_s7 }
 0x254   : > { %p642_p7 = pnand %p641_p4, %p759_p5 }
 0x255   : > { %p647_p11 = por %p646_p10, %p645_p9 }
 0x256   : > { %p643_p8 = pneg %p642_p7 }
 0x258   : > { %p648_p12 = pnand %p647_p11, %p643_p8 }
 0x25a   : > { %651 = shalt.err (!%p648_p12)
}
 0x25b   : > { %583 = dma.vmem_to_hbm [thread:$0]  (%p759_p5), %s442_s14, 128, %s439_s17, %s428_s23  }
 0x25c PF: > { %p589_p13 = scmp.ge.s32.totalorder %s686_s21, 2  ;;  %s453_s12 = sand.u32 1, %s674_s18  }
 0x25d   : > { %s454_s13 = scalar_lea.sflag [#allocation3], %s453_s12 }
 0x25e   : > { %p586_p0 = pnand %p589_p13, %p763_p6 }
 0x260   : > { %p587_p1 = pneg %p586_p0 }
 0x262   : > { %669 = dma.done.wait (%p587_p1), %s454_s13, 128  }
 0x263   : > { %671 = vsyncadd (%p587_p1), %s454_s13, 4294967168  ;;  %p15_p2 = scmp.ge.s32.totalorder %s746_s24, 4   ;;  %s916_s18 = smov %s678_s19 }
 0x264   : > { %s917_s19 = smov %s682_s20  ;;  %s918_s20 = smov %s757_s27 }
 0x265   : > { %s919_s21 = smov %s746_s24  ;;  %17 = sbr.rel (!%p15_p2) target bundleno = 3 (0x3), region = 75 }
 0x26a   :  { %459 = vsyncpa [#allocation3], 1 }
 0x26b   :  { %461 = vsyncpa [#allocation3 + $0x1], 1 }

</bundles_post_ra>
